<compile_context>
chip_gen: v7x
topology: tpu7x:2x2x1
jax: 0.10.0
libtpu: 0.0.40
codegen_flags: <defaults>
</compile_context>

<pallas_src>
import jax
import jax.numpy as jnp
from jax.experimental import pallas as pl
from jax.experimental.pallas import tpu as pltpu


def senet_kernel(x_ref, w_sq_ref, w_ex_ref, o_ref):
    # x_ref:    (tile_b, C_pad)   streaming dtype
    # w_sq_ref: (C_pad, H_pad)    squeeze.weight.T   (lane-dense in H_pad)
    # w_ex_ref: (H_pad, C_pad)    excitation.weight.T (lane-dense in C_pad)
    x = x_ref[...]

    # h = relu(x @ Wsq.T): (tile_b, C_pad) @ (C_pad, H_pad) -> f32 (tile_b, H_pad)
    h = jnp.dot(x, w_sq_ref[...], preferred_element_type=jnp.float32)
    h = jnp.maximum(h, 0.0)

    # logits = h @ Wex.T: (tile_b, H_pad) @ (H_pad, C_pad) -> f32 (tile_b, C_pad)
    logits = jnp.dot(h.astype(w_ex_ref.dtype), w_ex_ref[...],
                     preferred_element_type=jnp.float32)
    gates = jax.nn.sigmoid(logits)

    # Gate in the streaming dtype (no f32 copy of x; exact for f32 inputs).
    o_ref[...] = x * gates.astype(x.dtype)


def _round_up(n, m):
    return ((n + m - 1) // m) * m


def _choose_tiling(B, C_pad, H_pad, x_bytes, w_bytes, vmem_limit_bytes):
    """Pick (tile_b, grid_n) so the per-step working set fits the VMEM budget."""
    # Weight blocks: constant index_map -> fetched once, but budget the
    # pipeline's two buffers each to be safe.
    fixed = 2 * 2 * C_pad * H_pad * w_bytes
    per_row = (
        4 * C_pad * x_bytes   # x block + out block, double-buffered
        + 8 * H_pad           # f32 h (+ relu'd copy, conservative)
        + 8 * C_pad           # f32 logits + gates
        + C_pad * x_bytes     # downcast gates / product temporary
    )
    avail = int(vmem_limit_bytes * 0.85) - fixed
    max_rows = max(8, avail // per_row)
    tile_cap = max(8, min(2048, (max_rows // 8) * 8))

    # grid >= 2 once there is enough batch (pipelining + both v7x TCs),
    # and even so the two TensorCores get a balanced split.
    n = 1 if B < 16 else 2
    n = max(n, pl.cdiv(B, tile_cap))
    if n > 1 and n % 2 == 1:
        n += 1
    tile_b = _round_up(pl.cdiv(B, n), 8)
    return tile_b, n


def senet_forward(x, w_squeeze, w_excitation):
    """x: (B, C); w_squeeze: (C//r, C); w_excitation: (C, C//r) (torch nn.Linear layouts)."""
    B, C = x.shape
    H = w_squeeze.shape[0]
    x_bytes = jnp.dtype(x.dtype).itemsize

    # Hardware VMEM; cap at 64 MiB so sizing is safe per-TensorCore on v7x even
    # if the query reports per-chip capacity.
    try:
        vmem_cap = pltpu.get_tpu_info().vmem_capacity_bytes
    except Exception:
        vmem_cap = 64 * 1024 * 1024
    vmem_limit = int(min(vmem_cap, 64 * 1024 * 1024)) * 3 // 4

    # Lane / sublane friendly padded sizes.
    C_pad = _round_up(C, 128)
    H_pad = _round_up(max(H, 1), 128)

    # Weights: transpose once in the wrapper, cast to the streaming dtype,
    # zero-pad to the padded sizes (numerically exact, see header comment).
    w_dtype = x.dtype
    w_sq_t = w_squeeze.T.astype(w_dtype)      # (C, H)
    w_ex_t = w_excitation.T.astype(w_dtype)   # (H, C)
    if (C_pad, H_pad) != (C, H):
        w_sq_t = jnp.pad(w_sq_t, ((0, C_pad - C), (0, H_pad - H)))
        w_ex_t = jnp.pad(w_ex_t, ((0, H_pad - H), (0, C_pad - C)))
    w_bytes = jnp.dtype(w_dtype).itemsize

    tile_b, grid_n = _choose_tiling(B, C_pad, H_pad, x_bytes, w_bytes, vmem_limit)
    B_pad = tile_b * grid_n

    x_p = x
    if (B_pad, C_pad) != (B, C):
        x_p = jnp.pad(x, ((0, B_pad - B), (0, C_pad - C)))

    cost = pl.CostEstimate(
        flops=4 * B_pad * C_pad * H_pad + B_pad * C_pad,
        transcendentals=B_pad * C_pad,
        bytes_accessed=2 * B_pad * C_pad * x_bytes + 2 * C_pad * H_pad * w_bytes,
    )

    out_p = pl.pallas_call(
        senet_kernel,
        out_shape=jax.ShapeDtypeStruct((B_pad, C_pad), x.dtype),
        grid_spec=pl.GridSpec(
            grid=(grid_n,),
            in_specs=[
                pl.BlockSpec((tile_b, C_pad), lambda i: (i, 0)),
                pl.BlockSpec((C_pad, H_pad), lambda i: (0, 0)),  # resident squeeze weight
                pl.BlockSpec((H_pad, C_pad), lambda i: (0, 0)),  # resident excitation weight
            ],
            out_specs=pl.BlockSpec((tile_b, C_pad), lambda i: (i, 0)),
        ),
        compiler_params=pltpu.CompilerParams(
            dimension_semantics=("parallel",),
            vmem_limit_bytes=vmem_limit,
        ),
        cost_estimate=cost,
    )(x_p, w_sq_t, w_ex_t)

    if (B_pad, C_pad) != (B, C):
        out_p = out_p[:B, :C]
    return out_p


def senet_reference(x, w_squeeze, w_excitation):
    # Pure-JAX reference mirroring the PyTorch forward.
    gates = x @ w_squeeze.T
    gates = jnp.maximum(gates, 0.0)
    gates = gates @ w_excitation.T
    gates = jax.nn.sigmoid(gates)
    return x * gates


if __name__ == "__main__":
    key = jax.random.PRNGKey(0)
    batch, channels, ratio = 8, 32, 8
    hidden = channels // ratio

    k_x, k_w1, k_w2 = jax.random.split(key, 3)
    x = jax.random.normal(k_x, (batch, channels), dtype=jnp.float32)
    # nn.Linear weight layouts: (out_features, in_features), no bias.
    w_squeeze = jax.random.normal(k_w1, (hidden, channels), dtype=jnp.float32) * 0.1
    w_excitation = jax.random.normal(k_w2, (channels, hidden), dtype=jnp.float32) * 0.1

    out = senet_forward(x, w_squeeze, w_excitation)
    out = jax.block_until_ready(out)

    ref = senet_reference(x, w_squeeze, w_excitation)
    assert out.shape == x.shape and out.dtype == x.dtype
    assert jnp.allclose(out, ref, atol=1e-5, rtol=1e-5)

    print("KERNEL_OK")
</pallas_src>

<mosaic_0001>
module attributes {stable_mosaic.version = 11 : i64} {
  func.func @senet_kernel(%arg0: i32, %arg1: memref<8x128xf32, #tpu.memory_space<vmem>>, %arg2: memref<128x128xf32, #tpu.memory_space<vmem>>, %arg3: memref<128x128xf32, #tpu.memory_space<vmem>>, %arg4: memref<8x128xf32, #tpu.memory_space<vmem>>) attributes {dimension_semantics = [#tpu.dimension_semantics<parallel>], iteration_bounds = array<i64: 1>, scalar_prefetch = 0 : i64, scratch_operands = 0 : i64, tpu.core_type = #tpu.core_type<tc>, window_params = [{transform_indices = @transform_0, window_bounds = array<i64: 8, 128>}, {pipeline_mode = #tpu.pipeline_mode<synchronous>, transform_indices = @transform_1, window_bounds = array<i64: 128, 128>}, {pipeline_mode = #tpu.pipeline_mode<synchronous>, transform_indices = @transform_2, window_bounds = array<i64: 128, 128>}, {transform_indices = @transform_3, window_bounds = array<i64: 8, 128>}]} {
    %c0 = arith.constant 0 : index
    %c0_0 = arith.constant 0 : index
    %0 = vector.load %arg1[%c0, %c0_0] : memref<8x128xf32, #tpu.memory_space<vmem>>, vector<8x128xf32>
    %c0_1 = arith.constant 0 : index
    %c0_2 = arith.constant 0 : index
    %1 = vector.load %arg2[%c0_1, %c0_2] : memref<128x128xf32, #tpu.memory_space<vmem>>, vector<128x128xf32>
    %cst = arith.constant dense<0.000000e+00> : vector<8x128xf32>
    %2 = tpu.matmul %0, %1, %cst {dimension_numbers = #tpu.dot_dimension_numbers<[1], [0], [0], [1], [0, 0, 1, 1], [], []>} : vector<8x128xf32>, vector<128x128xf32>, vector<8x128xf32> -> vector<8x128xf32>
    %cst_3 = arith.constant 0.000000e+00 : f32
    %3 = vector.broadcast %cst_3 : f32 to vector<8x128xf32>
    %4 = arith.maximumf %2, %3 : vector<8x128xf32>
    %c0_4 = arith.constant 0 : index
    %c0_5 = arith.constant 0 : index
    %5 = vector.load %arg3[%c0_4, %c0_5] : memref<128x128xf32, #tpu.memory_space<vmem>>, vector<128x128xf32>
    %cst_6 = arith.constant dense<0.000000e+00> : vector<8x128xf32>
    %6 = tpu.matmul %4, %5, %cst_6 {dimension_numbers = #tpu.dot_dimension_numbers<[1], [0], [0], [1], [0, 0, 1, 1], [], []>} : vector<8x128xf32>, vector<128x128xf32>, vector<8x128xf32> -> vector<8x128xf32>
    %7 = arith.negf %6 : vector<8x128xf32>
    %8 = math.exp %7 : vector<8x128xf32>
    %cst_7 = arith.constant 1.000000e+00 : f32
    %9 = vector.broadcast %cst_7 : f32 to vector<8x128xf32>
    %10 = arith.addf %9, %8 : vector<8x128xf32>
    %11 = arith.divf %9, %10 : vector<8x128xf32>
    %12 = arith.mulf %0, %11 : vector<8x128xf32>
    %c0_8 = arith.constant 0 : index
    %c0_9 = arith.constant 0 : index
    %13 = vector.load %arg4[%c0_8, %c0_9] : memref<8x128xf32, #tpu.memory_space<vmem>>, vector<8x128xf32>
    tpu.vector_store %arg4[%c0_8, %c0_9], %12 {strides = array<i32>} : memref<8x128xf32, #tpu.memory_space<vmem>>, vector<8x128xf32>,
    return
  }
  func.func @transform_0(%arg0: i32) -> (i32, i32) {
    %c0_i32 = arith.constant 0 : i32
    %c0_i32_0 = arith.constant 0 : i32
    return %arg0, %c0_i32 : i32, i32
  }
  func.func @transform_1(%arg0: i32) -> (i32, i32) {
    %c0_i32 = arith.constant 0 : i32
    %c0_i32_0 = arith.constant 0 : i32
    %c0_i32_1 = arith.constant 0 : i32
    return %c0_i32, %c0_i32_0 : i32, i32
  }
  func.func @transform_2(%arg0: i32) -> (i32, i32) {
    %c0_i32 = arith.constant 0 : i32
    %c0_i32_0 = arith.constant 0 : i32
    %c0_i32_1 = arith.constant 0 : i32
    return %c0_i32, %c0_i32_0 : i32, i32
  }
  func.func @transform_3(%arg0: i32) -> (i32, i32) {
    %c0_i32 = arith.constant 0 : i32
    %c0_i32_0 = arith.constant 0 : i32
    return %arg0, %c0_i32 : i32, i32
  }
}

</mosaic_0001>

<bundles_post_ra>
// kernel: tpu_custom_call.1
= control target key start
LH: loop header
LB: loop body
LE: loop exit
PB: predicated region body
PF: predicated region fallthrough
CT: control target
= control target key end

     0   :  { %8 = vsyncpa [#allocation3], 0  ;;  %s611_s0 = inlined_call_operand.hbm [shape: f32[8,128], index: 0, kind: input, shape index: {}]   ;;  %s612_s1 = inlined_call_operand.hbm [shape: f32[128,128], index: 1, kind: input, shape index: {}]   ;;  %s613_s2 = inlined_call_operand.hbm [shape: f32[128,128], index: 2, kind: input, shape index: {}]   ;;  %s614_s3 = inlined_call_operand.hbm [shape: f32[8,128], index: 3, kind: output, shape index: {}]  }
   0x1   :  { %9 = vsyncpa [#allocation6], 0 }
   0x2   :  { %10 = vsyncpa [#allocation4], 0  ;;  %s512_s12 = smov [#allocation5]   ;;  %s418_s16 = scalar_lea.hbm %s612_s1, 2048 }
   0x3   :  { %s26_s13 = sshll.u32 %s512_s12, 4  ;;  %p419_p0 = scmp.ne.s32.totalorder %s612_s1, %s418_s16  ;;  %s27_s13 = int_to_ptr.vmem [resolvable:$true] %s26_s13 }
   0x4   :  { %p422_p1 = scmp.lt.u32.totalorder %s418_s16, %s612_s1 }
   0x6   :  { %p424_p2 = pnand %p422_p1, %p419_p0 }
   0x8   :  { %427 = shalt.err (!%p424_p2)
}
   0x9   :  { %s428_s21 = scalar_lea.vmem %s27_s13, 2048  ;;  %p433_p4 = scmp.lt.s32.totalorder %s27_s13, %s27_s13 }
   0xa   :  { %p429_p3 = scmp.ne.s32.totalorder %s27_s13, %s428_s21  ;;  %p434_p5 = scmp.lt.s32.totalorder %s428_s21, %s428_s21 }
   0xc   :  { %p435_p6 = por %p434_p5, %p433_p4 }
   0xe   :  { %p436_p7 = pnand %p435_p6, %p429_p3 }
  0x10   :  { %439 = shalt.err (!%p436_p7)
}
  0x11   :  { %s513_s22 = smov 128   ;;  %s514_s23 = smov 8  }
  0x12   :  { %32 = dma.hbm_to_vmem [thread:$0]  %s612_s1, 2048, %s27_s13, [#allocation6], %s513_s22, %s513_s22, %s514_s23  }
  0x13   :  { %s515_s26 = smov [#allocation2]   ;;  %s516_s28 = smov [#allocation7]  }
  0x14   :  { %s17_s27 = sshll.u32 %s515_s26, 4  ;;  %s38_s29 = sshll.u32 %s516_s28, 4  ;;  %s18_s27 = int_to_ptr.vmem [resolvable:$true] %s17_s27  ;;  %s39_s29 = int_to_ptr.vmem [resolvable:$true] %s38_s29 }
  0x15   :  { %s440_s5 = scalar_lea.hbm %s611_s0, 128 }
  0x16   :  { %p441_p8 = scmp.ne.s32.totalorder %s611_s0, %s440_s5  ;;  %p444_p9 = scmp.lt.u32.totalorder %s440_s5, %s611_s0 }
  0x18   :  { %p446_p10 = pnand %p444_p9, %p441_p8 }
  0x1a   :  { %449 = shalt.err (!%p446_p10)
}
  0x1b   :  { %s450_s1 = scalar_lea.vmem %s18_s27, 128  ;;  %p455_p12 = scmp.lt.s32.totalorder %s18_s27, %s18_s27 }
  0x1c   :  { %p451_p11 = scmp.ne.s32.totalorder %s18_s27, %s450_s1  ;;  %p456_p13 = scmp.lt.s32.totalorder %s450_s1, %s450_s1 }
  0x1e   :  { %p457_p0 = por %p456_p13, %p455_p12 }
  0x20   :  { %p458_p1 = pnand %p457_p0, %p451_p11 }
  0x22   :  { %461 = shalt.err (!%p458_p1)
}
  0x23   :  { %20 = dma.hbm_to_vmem [thread:$0]  %s611_s0, 128, %s18_s27, [#allocation3]  }
  0x24   :  { %s462_s14 = scalar_lea.hbm %s613_s2, 2048 }
  0x25   :  { %p463_p2 = scmp.ne.s32.totalorder %s613_s2, %s462_s14  ;;  %p466_p3 = scmp.lt.u32.totalorder %s462_s14, %s613_s2 }
  0x27   :  { %p468_p4 = pnand %p466_p3, %p463_p2 }
  0x29   :  { %471 = shalt.err (!%p468_p4)
}
  0x2a   :  { %s472_s19 = scalar_lea.vmem %s39_s29, 2048  ;;  %p477_p6 = scmp.lt.s32.totalorder %s39_s29, %s39_s29 }
  0x2b   :  { %p473_p5 = scmp.ne.s32.totalorder %s39_s29, %s472_s19  ;;  %p478_p7 = scmp.lt.s32.totalorder %s472_s19, %s472_s19 }
  0x2d   :  { %p479_p8 = por %p478_p7, %p477_p6 }
  0x2f   :  { %p480_p9 = pnand %p479_p8, %p473_p5 }
  0x31   :  { %483 = shalt.err (!%p480_p9)
}
  0x32   :  { %44 = dma.hbm_to_vmem [thread:$0]  %s613_s2, 2048, %s39_s29, [#allocation6], %s513_s22, %s513_s22, %s514_s23  }
  0x33   :  { %506 = dma.done.wait [#allocation3], 128  }
  0x34   :  { %507 = vsyncadd [#allocation3], 4294967168 }
  0x35   :  { %508 = dma.done.wait [#allocation6], 4096  }
  0x36   :  { %509 = vsyncadd [#allocation6], 4294963200  ;;  %v517_v0 = vmov 0.0|0.0   ;;  %vm518_vm0 = vmmov 0   ;;  %v519_v1 = vmov 0.0   ;;  %v55_v2 = vld [vmem:[#allocation5] sm:$0xff] }
  0x37   :  { %357 = vmatprep.subr.bf16.mxu0 %v517_v0  ;;  %319 = vmatprep.mubr.msk.f32.mxu0 %vm518_vm0, %v519_v1  ;;  %v56_v3 = vld [vmem:[#allocation5 + $0x8] sm:$0xff]  ;;  %v57_v4 = vld [vmem:[#allocation5 + $0x10] sm:$0xff]  ;;  %v58_v6 = vld [vmem:[#allocation5 + $0x18] sm:$0xff]  ;;  %s520_s2 = smov [#allocation8]  }
  0x38   :  { %381 = vmatprep.subr.bf16.mxu1 %v517_v0  ;;  %354 = vmatprep.mubr.msk.f32.mxu1 %vm518_vm0, %v519_v1  ;;  %v358_v5 = vpack.c.bf16 %v56_v3, %v55_v2  ;;  %v361_v7 = vpack.c.bf16 %v58_v6, %v57_v4  ;;  %v59_v8 = vld [vmem:[#allocation5 + $0x20] sm:$0xff]  ;;  %v60_v9 = vld [vmem:[#allocation5 + $0x28] sm:$0xff]  ;;  %v144_v12 = vld [vmem:[#allocation7 + $0x10] sm:$0xff]  ;;  %s242_s21 = sshll.u32 %s520_s2, 4  ;;  %s243_s21 = int_to_ptr.vmem [resolvable:$true] %s242_s21 }
  0x39   :  { %v142_v10 = vld [vmem:[#allocation7] sm:$0xff]  ;;  %v143_v11 = vld [vmem:[#allocation7 + $0x8] sm:$0xff]  ;;  %v145_v13 = vld [vmem:[#allocation7 + $0x18] sm:$0xff]  ;;  %v364_v14 = vpack.c.bf16 %v60_v9, %v59_v8  ;;  %s484_s22 = scalar_lea.vmem %s243_s21, 128  ;;  %p489_p11 = scmp.lt.s32.totalorder %s243_s21, %s243_s21 }
  0x3a   :  { %359 = vmatpush3.bf16.msra.mxu0 %v358_v5  ;;  %v382_v15 = vpack.c.bf16 %v143_v11, %v142_v10  ;;  %v61_v16 = vld [vmem:[#allocation5 + $0x30] sm:$0xff]  ;;  %v62_v17 = vld [vmem:[#allocation5 + $0x38] sm:$0xff]  ;;  %v385_v18 = vpack.c.bf16 %v145_v13, %v144_v12  ;;  %v146_v19 = vld [vmem:[#allocation7 + $0x20] sm:$0xff]  ;;  %p485_p10 = scmp.ne.s32.totalorder %s243_s21, %s484_s22  ;;  %p490_p12 = scmp.lt.s32.totalorder %s484_s22, %s484_s22 }
  0x3b   :  { %360 = vmatprep.subr.bf16.mxu0 %v517_v0  ;;  %v147_v20 = vld [vmem:[#allocation7 + $0x28] sm:$0xff]  ;;  %v367_v21 = vpack.c.bf16 %v62_v17, %v61_v16  ;;  %v63_v22 = vld [vmem:[#allocation5 + $0x40] sm:$0xff]  ;;  %v148_v25 = vld [vmem:[#allocation7 + $0x30] sm:$0xff] }
  0x3c   :  { %383 = vmatpush3.bf16.msra.mxu1 %v382_v15  ;;  %v64_v23 = vld [vmem:[#allocation5 + $0x48] sm:$0xff]  ;;  %v388_v24 = vpack.c.bf16 %v147_v20, %v146_v19  ;;  %v149_v26 = vld [vmem:[#allocation7 + $0x38] sm:$0xff]  ;;  %v65_v28 = vld [vmem:[#allocation5 + $0x50] sm:$0xff]  ;;  %p491_p13 = por %p490_p12, %p489_p11 }
  0x3d   :  { %384 = vmatprep.subr.bf16.mxu1 %v517_v0  ;;  %v370_v27 = vpack.c.bf16 %v64_v23, %v63_v22  ;;  %v66_v29 = vld [vmem:[#allocation5 + $0x58] sm:$0xff]  ;;  %v391_v30 = vpack.c.bf16 %v149_v26, %v148_v25  ;;  %v150_v31 = vld [vmem:[#allocation7 + $0x40] sm:$0xff]  ;;  %v151_v32 = vld [vmem:[#allocation7 + $0x48] sm:$0xff] }
  0x3e   :  { %362 = vmatpush3.bf16.msra.mxu0 %v361_v7  ;;  %v373_v33 = vpack.c.bf16 %v66_v29, %v65_v28  ;;  %v67_v34 = vld [vmem:[#allocation5 + $0x60] sm:$0xff]  ;;  %v68_v35 = vld [vmem:[#allocation5 + $0x68] sm:$0xff]  ;;  %v394_v36 = vpack.c.bf16 %v151_v32, %v150_v31  ;;  %v152_v37 = vld [vmem:[#allocation7 + $0x50] sm:$0xff]  ;;  %p492_p0 = pnand %p491_p13, %p485_p10 }
  0x3f   :  { %363 = vmatprep.subr.bf16.mxu0 %v517_v0  ;;  %v153_v38 = vld [vmem:[#allocation7 + $0x58] sm:$0xff]  ;;  %v376_v39 = vpack.c.bf16 %v68_v35, %v67_v34  ;;  %v69_v40 = vld [vmem:[#allocation5 + $0x70] sm:$0xff]  ;;  %v154_v43 = vld [vmem:[#allocation7 + $0x60] sm:$0xff] }
  0x40   :  { %386 = vmatpush3.bf16.msra.mxu1 %v385_v18  ;;  %v70_v41 = vld [vmem:[#allocation5 + $0x78] sm:$0xff]  ;;  %v397_v42 = vpack.c.bf16 %v153_v38, %v152_v37  ;;  %v155_v44 = vld [vmem:[#allocation7 + $0x68] sm:$0xff]  ;;  %v156_v48 = vld [vmem:[#allocation7 + $0x70] sm:$0xff] }
  0x41   :  { %387 = vmatprep.subr.bf16.mxu1 %v517_v0  ;;  %v379_v45 = vpack.c.bf16 %v70_v41, %v69_v40  ;;  %v400_v46 = vpack.c.bf16 %v155_v44, %v154_v43  ;;  %v54_v47 = vld [vmem:[#allocation2] sm:$0xff] }
  0x42   :  { %365 = vmatpush3.bf16.msra.mxu0 %v364_v14  ;;  %v157_v49 = vld [vmem:[#allocation7 + $0x78] sm:$0xff] }
  0x43   :  { %366 = vmatprep.subr.bf16.mxu0 %v517_v0  ;;  %v403_v50 = vpack.c.bf16 %v157_v49, %v156_v48 }
  0x44   :  { %389 = vmatpush3.bf16.msra.mxu1 %v388_v24 }
  0x45   :  { %390 = vmatprep.subr.bf16.mxu1 %v517_v0 }
  0x46   :  { %368 = vmatpush3.bf16.msra.mxu0 %v367_v21 }
  0x47   :  { %369 = vmatprep.subr.bf16.mxu0 %v517_v0 }
  0x48   :  { %392 = vmatpush3.bf16.msra.mxu1 %v391_v30 }
  0x49   :  { %393 = vmatprep.subr.bf16.mxu1 %v517_v0 }
  0x4a   :  { %371 = vmatpush3.bf16.msra.mxu0 %v370_v27 }
  0x4b   :  { %372 = vmatprep.subr.bf16.mxu0 %v517_v0 }
  0x4c   :  { %395 = vmatpush3.bf16.msra.mxu1 %v394_v36 }
  0x4d   :  { %396 = vmatprep.subr.bf16.mxu1 %v517_v0 }
  0x4e   :  { %374 = vmatpush3.bf16.msra.mxu0 %v373_v33 }
  0x4f   :  { %375 = vmatprep.subr.bf16.mxu0 %v517_v0 }
  0x50   :  { %398 = vmatpush3.bf16.msra.mxu1 %v397_v42 }
  0x51   :  { %399 = vmatprep.subr.bf16.mxu1 %v517_v0 }
  0x52   :  { %377 = vmatpush3.bf16.msra.mxu0 %v376_v39 }
  0x53   :  { %378 = vmatprep.subr.bf16.mxu0 %v517_v0 }
  0x54   :  { %401 = vmatpush3.bf16.msra.mxu1 %v400_v46 }
  0x55   :  { %402 = vmatprep.subr.bf16.mxu1 %v517_v0 }
  0x56   :  { %380 = vmatpush3.bf16.msra.mxu0 %v379_v45 }
  0x58   :  { %404 = vmatpush3.bf16.msra.mxu1 %v403_v50 }
  0x59   :  { %320 = vmatmul.mubr.f32.vlgmr.msra.gmra.mrb[0].mxu0 %v54_v47 }
 0x12c   :  { %v137_v51 = vpop.f32.mrb[0].mxu0 }
 0x12d   :  { %v141_v52 = vmax.f32 %v137_v51, 0.0  ;;  %v321_v53 = vpop.f32.mrb[1].mxu0 }
 0x12f   :  { %355 = vmatmul.mubr.f32.vlgmr.msra.gmra.mrb[0].mxu1 %v141_v52 }
 0x202   :  { %v224_v54 = vpop.f32.mrb[0].mxu1 }
 0x203   :  { %v252_v55 = vmul.f32 -1.442695, %v224_v54  ;;  %v356_v56 = vpop.f32.mrb[1].mxu1 }
 0x205   :  { %414 = vpow2.f32 %v252_v55 }
 0x20f   :  { %v415_v57 = vpop.eup %414 }
 0x210   :  { %v231_v58 = vadd.f32 1.0, %v415_v57 }
 0x212   :  { %416 = vrcp.f32 %v231_v58 }
 0x21c   :  { %v417_v59 = vpop.eup %416 }
 0x21d   :  { %v234_v60 = vmul.f32 %v417_v59, %v54_v47 }
 0x21f   :  { %235 = vst [vmem:[#allocation8] sm:$0xff] %v234_v60 }
 0x220   :  { %495 = shalt.err (!%p492_p0)
}
 0x221   :  { %s496_s25 = scalar_lea.hbm %s614_s3, 128 }
 0x222   :  { %p497_p1 = scmp.ne.s32.totalorder %s614_s3, %s496_s25  ;;  %p500_p2 = scmp.lt.u32.totalorder %s496_s25, %s614_s3 }
 0x224   :  { %p502_p3 = pnand %p500_p2, %p497_p1 }
 0x226   :  { %505 = shalt.err (!%p502_p3)
}
 0x227   :  { %245 = dma.vmem_to_hbm [thread:$0]  %s243_s21, 128, %s614_s3, [#allocation4]  }
 0x228   :  { %510 = dma.done.wait [#allocation4], 128  }
 0x229   :  { %511 = vsyncadd [#allocation4], 4294967168 }
 0x22a   :  { %249 = vsyncpa [#allocation3], 1 }
 0x22b   :  { %250 = vsyncpa [#allocation6], 1 }
 0x22c   :  { %251 = vsyncpa [#allocation4], 1 }

</bundles_post_ra>
